<compile_context>
chip_gen: v5e
topology: v5e:2x2
jax: 0.10.0
libtpu: 0.0.40
codegen_flags: <defaults>
</compile_context>

<pallas_src>
import functools
import math

import jax
import jax.numpy as jnp
from jax.experimental import pallas as pl
from jax.experimental.pallas import tpu as pltpu


def _round_up(x, m):
    return (x + m - 1) // m * m


def _pick_batch_block(b2, n):
    """Largest divisor of b2 such that b_blk*N ~<= 128 rows per grid step,
    while keeping >= 2 grid steps when b2 > 1 (v7x has 2 TensorCores)."""
    target = max(1, 128 // max(n, 1))
    if b2 > 1:
        target = min(target, max(1, b2 // 2))
    best = 1
    for cand in range(1, min(b2, target) + 1):
        if b2 % cand == 0:
            best = cand
    return best


def _cross_attn_kernel(scale, heads, dim_head, b_blk, n, dim, pad_lanes, mm_dtype,
                       xq_ref, xkv_ref, wqkvT_ref, woutT_ref, bout_ref,
                       slab_ref):
    """One grid step = b_blk batch-half elements, all heads (static unroll)."""
    d = dim_head
    inner = heads * d

    # (b_blk, N, dim) -> (b_blk*N, dim): collapse of leading dims (N == 8 is a
    # full sublane tile), free.
    xq = xq_ref[...].reshape(b_blk * n, dim)
    xkv = xkv_ref[...].reshape(b_blk * n, dim)
    wqkvT = wqkvT_ref[...]

    # Full-width QKV projections over the whole batch block (MXU, f32 accum).
    # Scale hoisted out of the head loop: fold it into q once.
    q_all = jnp.dot(xq, wqkvT, preferred_element_type=jnp.float32) * scale
    kv_all = jnp.dot(xkv, wqkvT, preferred_element_type=jnp.float32)

    q3 = q_all.reshape(b_blk, n, inner)
    kv3 = kv_all.reshape(b_blk, n, inner)

    dots_parts = []
    attn_parts = []
    out_parts = []
    for h in range(heads):                       # static unroll; heads is small
        q_h = q3[..., h * d:(h + 1) * d].astype(mm_dtype)      # (b_blk, N, d)
        kv_h_mm = kv3[..., h * d:(h + 1) * d].astype(mm_dtype)

        # dots = scale * q @ kv^T  (scale already folded into q).
        dots_h = jnp.einsum('bid,bjd->bij', q_h, kv_h_mm,
                            preferred_element_type=jnp.float32)  # (b_blk, N, N)

        # Row-wise softmax, kept in f32; exact reciprocal (EUP slack is huge).
        m = jnp.max(dots_h, axis=-1, keepdims=True)
        e = jnp.exp(dots_h - m)
        s = jnp.sum(e, axis=-1, keepdims=True)
        attn_h = e * pl.reciprocal(s)

        out_parts.append(
            jnp.einsum('bij,bjd->bid', attn_h.astype(mm_dtype), kv_h_mm,
                       preferred_element_type=jnp.float32))      # (b_blk, N, d)
        dots_parts.append(dots_h)
        attn_parts.append(attn_h)

    # ONE full-width output projection; bias folded into the final write.
    out_cat = jnp.concatenate(out_parts, axis=-1)                # (b_blk, N, inner)
    proj = jnp.dot(out_cat.reshape(b_blk * n, inner).astype(mm_dtype),
                   woutT_ref[...],
                   preferred_element_type=jnp.float32).reshape(b_blk, n, dim)
    proj = proj + bout_ref[...]                                  # (1, dim) broadcast

    # Single lane-dense slab store: [ out | attn(h*N+j) | dots(h*N+j) | 0-pad ].
    pieces = [proj,
              jnp.concatenate(attn_parts, axis=-1),
              jnp.concatenate(dots_parts, axis=-1)]
    if pad_lanes > 0:
        pieces.append(jnp.zeros((b_blk, n, pad_lanes), jnp.float32))
    slab_ref[...] = jnp.concatenate(pieces, axis=-1)


def cross_attention(x, w_qkv, w_out, b_out, *, heads, dim_head,
                    mask=None, matmul_dtype=jnp.float32):
    """Pallas implementation of Cross_Attention.forward (mask=None).

    matmul_dtype=jnp.bfloat16 feeds bf16 operands to the MXU (f32 accumulation)
    — the fast path on v6e/v7x; keep f32 when bit-tight aux outputs are needed.
    """
    if mask is not None:
        # TODO(synk): optional boolean mask branch not implemented.
        raise NotImplementedError("cross_attention: only mask=None is supported")

    x = jnp.asarray(x)
    if x.ndim == 2:
        x = x[None]           # matches torch unsqueeze(0)
    B, N, dim = x.shape
    if B % 2 != 0:
        # Same failure mode as PyTorch: chunk(2, dim=0) must yield (q, kv).
        raise ValueError("batch must be even: to_qkv(x) is chunked into (q, kv) on dim 0")
    B2 = B // 2
    d = dim_head
    inner = heads * d
    assert w_qkv.shape == (inner, dim)
    assert w_out.shape == (dim, inner)

    scale = float(d) ** -0.5
    aux_w = heads * N                       # packed width of attn / dots per row
    slab_w = dim + 2 * aux_w
    P = _round_up(slab_w, 128)              # pad to full lanes -> unmasked stores
    pad_lanes = P - slab_w

    b_blk = _pick_batch_block(B2, N)
    grid = (B2 // b_blk,)

    mm_dtype = jnp.dtype(matmul_dtype)
    x_q = x[:B2].astype(mm_dtype)                            # queries half
    x_kv = x[B2:].astype(mm_dtype)                           # keys/values half
    w_qkvT = jnp.asarray(w_qkv).T.astype(mm_dtype)           # (dim, inner) pre-transposed
    w_outT = jnp.asarray(w_out).T.astype(mm_dtype)           # (inner, dim)
    b_out2d = jnp.asarray(b_out, jnp.float32).reshape(1, dim)

    kernel = functools.partial(_cross_attn_kernel, scale, heads, d, b_blk, N,
                               dim, pad_lanes, mm_dtype)

    slab = pl.pallas_call(
        kernel,
        out_shape=jax.ShapeDtypeStruct((B2, N, P), jnp.float32),
        grid_spec=pltpu.PrefetchScalarGridSpec(
            num_scalar_prefetch=0,
            grid=grid,
            in_specs=[
                pl.BlockSpec((b_blk, N, dim), lambda i: (i, 0, 0)),   # x_q block
                pl.BlockSpec((b_blk, N, dim), lambda i: (i, 0, 0)),   # x_kv block
                pl.BlockSpec((dim, inner), lambda i: (0, 0)),         # W_qkv^T
                pl.BlockSpec((inner, dim), lambda i: (0, 0)),         # W_out^T
                pl.BlockSpec((1, dim), lambda i: (0, 0)),             # bias
            ],
            out_specs=pl.BlockSpec((b_blk, N, P), lambda i: (i, 0, 0)),
        ),
        compiler_params=pltpu.CompilerParams(
            dimension_semantics=("parallel",)),
    )(x_q, x_kv, w_qkvT, w_outT, b_out2d)

    # Unpack the slab on the XLA side (tiny).
    out = slab[:, :, :dim]
    attn = slab[:, :, dim:dim + aux_w].reshape(B2, N, heads, N).transpose(0, 2, 1, 3)
    dots = slab[:, :, dim + aux_w:dim + 2 * aux_w].reshape(B2, N, heads, N).transpose(0, 2, 1, 3)

    out_full = jnp.concatenate([out, out], axis=0)           # torch.cat((out, out), 0)
    return out_full, {"attn": attn, "dot_qk": dots}


def _reference(x, w_qkv, w_out, b_out, *, heads, dim_head):
    """Pure-JAX reference mirroring the PyTorch forward (mask=None)."""
    B, N, dim = x.shape
    B2 = B // 2
    qkv = x @ w_qkv.T                                        # (B, N, inner)
    q = qkv[:B2].reshape(B2, N, heads, dim_head).transpose(0, 2, 1, 3)
    kv = qkv[B2:].reshape(B2, N, heads, dim_head).transpose(0, 2, 1, 3)
    dots = jnp.einsum("bhid,bhjd->bhij", q, kv) * (dim_head ** -0.5)
    attn = jax.nn.softmax(dots, axis=-1)
    out = jnp.einsum("bhij,bhjd->bhid", attn, kv)
    out = out.transpose(0, 2, 1, 3).reshape(B2, N, heads * dim_head)
    out = out @ w_out.T + b_out
    return jnp.concatenate([out, out], axis=0), attn, dots


if __name__ == "__main__":
    # Module config: dim=32, heads=4, dim_head=8, dropout=0.0 (identity in eval)
    dim, heads, dim_head = 32, 4, 8
    inner = heads * dim_head
    N = 8

    key = jax.random.PRNGKey(0)
    kx, kq, kw, kb = jax.random.split(key, 4)
    # Deterministic synthetic parameters (PyTorch Linear convention: (out, in))
    w_qkv = jax.random.normal(kq, (inner, dim), dtype=jnp.float32) / math.sqrt(dim)
    w_out = jax.random.normal(kw, (dim, inner), dtype=jnp.float32) / math.sqrt(inner)
    b_out = jax.random.normal(kb, (dim,), dtype=jnp.float32) * 0.1

    # --- A: minimal module-shaped batch (B=2), full f32 path ----------------
    x2 = jax.random.normal(kx, (2, N, dim), dtype=jnp.float32)
    out2, aux2 = cross_attention(x2, w_qkv, w_out, b_out, heads=heads, dim_head=dim_head)
    jax.block_until_ready(out2)
    r_out2, r_attn2, r_dots2 = _reference(x2, w_qkv, w_out, b_out,
                                          heads=heads, dim_head=dim_head)
    assert jnp.allclose(out2, r_out2, atol=1e-3, rtol=1e-3)
    assert jnp.allclose(aux2["attn"], r_attn2, atol=5e-4, rtol=5e-4)
    assert jnp.allclose(aux2["dot_qk"], r_dots2, atol=1e-4, rtol=1e-4)

    # --- B: larger batch exercising the batch-blocked, multi-step grid ------
    x8 = jax.random.normal(jax.random.fold_in(kx, 1), (8, N, dim), dtype=jnp.float32)
    out8, aux8 = cross_attention(x8, w_qkv, w_out, b_out, heads=heads, dim_head=dim_head)
    jax.block_until_ready(out8)
    r_out8, r_attn8, r_dots8 = _reference(x8, w_qkv, w_out, b_out,
                                          heads=heads, dim_head=dim_head)
    assert jnp.allclose(out8, r_out8, atol=1e-3, rtol=1e-3)
    assert jnp.allclose(aux8["attn"], r_attn8, atol=5e-4, rtol=5e-4)
    assert jnp.allclose(aux8["dot_qk"], r_dots8, atol=1e-4, rtol=1e-4)

    # --- C: bf16 MXU operands (v6e/v7x fast path), f32 accumulation ---------
    out_bf, aux_bf = cross_attention(x8, w_qkv, w_out, b_out, heads=heads,
                                     dim_head=dim_head, matmul_dtype=jnp.bfloat16)
    jax.block_until_ready(out_bf)
    assert jnp.allclose(out_bf, r_out8, atol=1e-1, rtol=1e-1)
    assert jnp.allclose(aux_bf["attn"], r_attn8, atol=1e-1, rtol=1e-1)
    assert jnp.allclose(aux_bf["dot_qk"], r_dots8, atol=1e-1, rtol=1e-1)

    print("KERNEL_OK")
</pallas_src>

<mosaic_0001>
module attributes {stable_mosaic.version = 11 : i64} {
  func.func @_cross_attn_kernel(%arg0: i32, %arg1: memref<1x8x32xf32, #tpu.memory_space<vmem>>, %arg2: memref<1x8x32xf32, #tpu.memory_space<vmem>>, %arg3: memref<32x32xf32, #tpu.memory_space<vmem>>, %arg4: memref<32x32xf32, #tpu.memory_space<vmem>>, %arg5: memref<1x32xf32, #tpu.memory_space<vmem>>, %arg6: memref<1x8x128xf32, #tpu.memory_space<vmem>>) attributes {dimension_semantics = [#tpu.dimension_semantics<parallel>], iteration_bounds = array<i64: 1>, scalar_prefetch = 0 : i64, scratch_operands = 0 : i64, tpu.core_type = #tpu.core_type<tc>, window_params = [{transform_indices = @transform_0, window_bounds = array<i64: 1, 8, 32>}, {transform_indices = @transform_1, window_bounds = array<i64: 1, 8, 32>}, {pipeline_mode = #tpu.pipeline_mode<synchronous>, transform_indices = @transform_2, window_bounds = array<i64: 32, 32>}, {pipeline_mode = #tpu.pipeline_mode<synchronous>, transform_indices = @transform_3, window_bounds = array<i64: 32, 32>}, {pipeline_mode = #tpu.pipeline_mode<synchronous>, transform_indices = @transform_4, window_bounds = array<i64: 1, 32>}, {transform_indices = @transform_5, window_bounds = array<i64: 1, 8, 128>}]} {
    %c0 = arith.constant 0 : index
    %c0_0 = arith.constant 0 : index
    %c0_1 = arith.constant 0 : index
    %0 = vector.load %arg1[%c0, %c0_0, %c0_1] : memref<1x8x32xf32, #tpu.memory_space<vmem>>, vector<1x8x32xf32>
    %1 = vector.shape_cast %0 : vector<1x8x32xf32> to vector<8x32xf32>
    %c0_2 = arith.constant 0 : index
    %c0_3 = arith.constant 0 : index
    %c0_4 = arith.constant 0 : index
    %2 = vector.load %arg2[%c0_2, %c0_3, %c0_4] : memref<1x8x32xf32, #tpu.memory_space<vmem>>, vector<1x8x32xf32>
    %3 = vector.shape_cast %2 : vector<1x8x32xf32> to vector<8x32xf32>
    %c0_5 = arith.constant 0 : index
    %c0_6 = arith.constant 0 : index
    %4 = vector.load %arg3[%c0_5, %c0_6] : memref<32x32xf32, #tpu.memory_space<vmem>>, vector<32x32xf32>
    %cst = arith.constant dense<0.000000e+00> : vector<8x32xf32>
    %5 = tpu.matmul %1, %4, %cst {dimension_numbers = #tpu.dot_dimension_numbers<[1], [0], [0], [1], [0, 0, 1, 1], [], []>} : vector<8x32xf32>, vector<32x32xf32>, vector<8x32xf32> -> vector<8x32xf32>
    %cst_7 = arith.constant 0.353553385 : f32
    %6 = vector.broadcast %cst_7 : f32 to vector<8x32xf32>
    %7 = arith.mulf %5, %6 : vector<8x32xf32>
    %cst_8 = arith.constant dense<0.000000e+00> : vector<8x32xf32>
    %8 = tpu.matmul %3, %4, %cst_8 {dimension_numbers = #tpu.dot_dimension_numbers<[1], [0], [0], [1], [0, 0, 1, 1], [], []>} : vector<8x32xf32>, vector<32x32xf32>, vector<8x32xf32> -> vector<8x32xf32>
    %9 = vector.shape_cast %7 : vector<8x32xf32> to vector<1x8x32xf32>
    %10 = vector.shape_cast %8 : vector<8x32xf32> to vector<1x8x32xf32>
    %11 = vector.extract_strided_slice %9 {offsets = [0, 0, 0], sizes = [1, 8, 8], strides = [1, 1, 1]} : vector<1x8x32xf32> to vector<1x8x8xf32>
    %12 = vector.extract_strided_slice %10 {offsets = [0, 0, 0], sizes = [1, 8, 8], strides = [1, 1, 1]} : vector<1x8x32xf32> to vector<1x8x8xf32>
    "tpu.trace_start"() <{level = 10 : i32, message = "bid,bjd->bij"}> : () -> ()
    %cst_9 = arith.constant dense<0.000000e+00> : vector<1x8x8xf32>
    %13 = tpu.matmul %11, %12, %cst_9 {dimension_numbers = #tpu.dot_dimension_numbers<[2], [2], [1], [1], [0, 0, 0, 1, 1, 1], [0], [0]>} : vector<1x8x8xf32>, vector<1x8x8xf32>, vector<1x8x8xf32> -> vector<1x8x8xf32>
    "tpu.trace_stop"() : () -> ()
    %cst_10 = arith.constant dense<0xFF800000> : vector<1x8xf32>
    %14 = vector.multi_reduction <maximumf>, %13, %cst_10 [2] : vector<1x8x8xf32> to vector<1x8xf32>
    %15 = vector.shape_cast %14 : vector<1x8xf32> to vector<1x8x1xf32>
    %16 = vector.broadcast %15 : vector<1x8x1xf32> to vector<1x8x8xf32>
    %17 = arith.subf %13, %16 : vector<1x8x8xf32>
    %18 = math.exp %17 : vector<1x8x8xf32>
    %cst_11 = arith.constant dense<0.000000e+00> : vector<1x8xf32>
    %19 = vector.multi_reduction <add>, %18, %cst_11 [2] : vector<1x8x8xf32> to vector<1x8xf32>
    %20 = vector.shape_cast %19 : vector<1x8xf32> to vector<1x8x1xf32>
    %21 = tpu.reciprocal %20 : vector<1x8x1xf32> -> vector<1x8x1xf32>
    %22 = vector.broadcast %21 : vector<1x8x1xf32> to vector<1x8x8xf32>
    %23 = arith.mulf %18, %22 : vector<1x8x8xf32>
    "tpu.trace_start"() <{level = 10 : i32, message = "bij,bjd->bid"}> : () -> ()
    %cst_12 = arith.constant dense<0.000000e+00> : vector<1x8x8xf32>
    %24 = tpu.matmul %23, %12, %cst_12 {dimension_numbers = #tpu.dot_dimension_numbers<[2], [1], [1], [2], [0, 0, 0, 1, 1, 2], [0], [0]>} : vector<1x8x8xf32>, vector<1x8x8xf32>, vector<1x8x8xf32> -> vector<1x8x8xf32>
    "tpu.trace_stop"() : () -> ()
    %25 = vector.extract_strided_slice %9 {offsets = [0, 0, 8], sizes = [1, 8, 8], strides = [1, 1, 1]} : vector<1x8x32xf32> to vector<1x8x8xf32>
    %26 = vector.extract_strided_slice %10 {offsets = [0, 0, 8], sizes = [1, 8, 8], strides = [1, 1, 1]} : vector<1x8x32xf32> to vector<1x8x8xf32>
    "tpu.trace_start"() <{level = 10 : i32, message = "bid,bjd->bij"}> : () -> ()
    %cst_13 = arith.constant dense<0.000000e+00> : vector<1x8x8xf32>
    %27 = tpu.matmul %25, %26, %cst_13 {dimension_numbers = #tpu.dot_dimension_numbers<[2], [2], [1], [1], [0, 0, 0, 1, 1, 1], [0], [0]>} : vector<1x8x8xf32>, vector<1x8x8xf32>, vector<1x8x8xf32> -> vector<1x8x8xf32>
    "tpu.trace_stop"() : () -> ()
    %cst_14 = arith.constant dense<0xFF800000> : vector<1x8xf32>
    %28 = vector.multi_reduction <maximumf>, %27, %cst_14 [2] : vector<1x8x8xf32> to vector<1x8xf32>
    %29 = vector.shape_cast %28 : vector<1x8xf32> to vector<1x8x1xf32>
    %30 = vector.broadcast %29 : vector<1x8x1xf32> to vector<1x8x8xf32>
    %31 = arith.subf %27, %30 : vector<1x8x8xf32>
    %32 = math.exp %31 : vector<1x8x8xf32>
    %cst_15 = arith.constant dense<0.000000e+00> : vector<1x8xf32>
    %33 = vector.multi_reduction <add>, %32, %cst_15 [2] : vector<1x8x8xf32> to vector<1x8xf32>
    %34 = vector.shape_cast %33 : vector<1x8xf32> to vector<1x8x1xf32>
    %35 = tpu.reciprocal %34 : vector<1x8x1xf32> -> vector<1x8x1xf32>
    %36 = vector.broadcast %35 : vector<1x8x1xf32> to vector<1x8x8xf32>
    %37 = arith.mulf %32, %36 : vector<1x8x8xf32>
    "tpu.trace_start"() <{level = 10 : i32, message = "bij,bjd->bid"}> : () -> ()
    %cst_16 = arith.constant dense<0.000000e+00> : vector<1x8x8xf32>
    %38 = tpu.matmul %37, %26, %cst_16 {dimension_numbers = #tpu.dot_dimension_numbers<[2], [1], [1], [2], [0, 0, 0, 1, 1, 2], [0], [0]>} : vector<1x8x8xf32>, vector<1x8x8xf32>, vector<1x8x8xf32> -> vector<1x8x8xf32>
    "tpu.trace_stop"() : () -> ()
    %39 = vector.extract_strided_slice %9 {offsets = [0, 0, 16], sizes = [1, 8, 8], strides = [1, 1, 1]} : vector<1x8x32xf32> to vector<1x8x8xf32>
    %40 = vector.extract_strided_slice %10 {offsets = [0, 0, 16], sizes = [1, 8, 8], strides = [1, 1, 1]} : vector<1x8x32xf32> to vector<1x8x8xf32>
    "tpu.trace_start"() <{level = 10 : i32, message = "bid,bjd->bij"}> : () -> ()
    %cst_17 = arith.constant dense<0.000000e+00> : vector<1x8x8xf32>
    %41 = tpu.matmul %39, %40, %cst_17 {dimension_numbers = #tpu.dot_dimension_numbers<[2], [2], [1], [1], [0, 0, 0, 1, 1, 1], [0], [0]>} : vector<1x8x8xf32>, vector<1x8x8xf32>, vector<1x8x8xf32> -> vector<1x8x8xf32>
    "tpu.trace_stop"() : () -> ()
    %cst_18 = arith.constant dense<0xFF800000> : vector<1x8xf32>
    %42 = vector.multi_reduction <maximumf>, %41, %cst_18 [2] : vector<1x8x8xf32> to vector<1x8xf32>
    %43 = vector.shape_cast %42 : vector<1x8xf32> to vector<1x8x1xf32>
    %44 = vector.broadcast %43 : vector<1x8x1xf32> to vector<1x8x8xf32>
    %45 = arith.subf %41, %44 : vector<1x8x8xf32>
    %46 = math.exp %45 : vector<1x8x8xf32>
    %cst_19 = arith.constant dense<0.000000e+00> : vector<1x8xf32>
    %47 = vector.multi_reduction <add>, %46, %cst_19 [2] : vector<1x8x8xf32> to vector<1x8xf32>
    %48 = vector.shape_cast %47 : vector<1x8xf32> to vector<1x8x1xf32>
    %49 = tpu.reciprocal %48 : vector<1x8x1xf32> -> vector<1x8x1xf32>
    %50 = vector.broadcast %49 : vector<1x8x1xf32> to vector<1x8x8xf32>
    %51 = arith.mulf %46, %50 : vector<1x8x8xf32>
    "tpu.trace_start"() <{level = 10 : i32, message = "bij,bjd->bid"}> : () -> ()
    %cst_20 = arith.constant dense<0.000000e+00> : vector<1x8x8xf32>
    %52 = tpu.matmul %51, %40, %cst_20 {dimension_numbers = #tpu.dot_dimension_numbers<[2], [1], [1], [2], [0, 0, 0, 1, 1, 2], [0], [0]>} : vector<1x8x8xf32>, vector<1x8x8xf32>, vector<1x8x8xf32> -> vector<1x8x8xf32>
    "tpu.trace_stop"() : () -> ()
    %53 = vector.extract_strided_slice %9 {offsets = [0, 0, 24], sizes = [1, 8, 8], strides = [1, 1, 1]} : vector<1x8x32xf32> to vector<1x8x8xf32>
    %54 = vector.extract_strided_slice %10 {offsets = [0, 0, 24], sizes = [1, 8, 8], strides = [1, 1, 1]} : vector<1x8x32xf32> to vector<1x8x8xf32>
    "tpu.trace_start"() <{level = 10 : i32, message = "bid,bjd->bij"}> : () -> ()
    %cst_21 = arith.constant dense<0.000000e+00> : vector<1x8x8xf32>
    %55 = tpu.matmul %53, %54, %cst_21 {dimension_numbers = #tpu.dot_dimension_numbers<[2], [2], [1], [1], [0, 0, 0, 1, 1, 1], [0], [0]>} : vector<1x8x8xf32>, vector<1x8x8xf32>, vector<1x8x8xf32> -> vector<1x8x8xf32>
    "tpu.trace_stop"() : () -> ()
    %cst_22 = arith.constant dense<0xFF800000> : vector<1x8xf32>
    %56 = vector.multi_reduction <maximumf>, %55, %cst_22 [2] : vector<1x8x8xf32> to vector<1x8xf32>
    %57 = vector.shape_cast %56 : vector<1x8xf32> to vector<1x8x1xf32>
    %58 = vector.broadcast %57 : vector<1x8x1xf32> to vector<1x8x8xf32>
    %59 = arith.subf %55, %58 : vector<1x8x8xf32>
    %60 = math.exp %59 : vector<1x8x8xf32>
    %cst_23 = arith.constant dense<0.000000e+00> : vector<1x8xf32>
    %61 = vector.multi_reduction <add>, %60, %cst_23 [2] : vector<1x8x8xf32> to vector<1x8xf32>
    %62 = vector.shape_cast %61 : vector<1x8xf32> to vector<1x8x1xf32>
    %63 = tpu.reciprocal %62 : vector<1x8x1xf32> -> vector<1x8x1xf32>
    %64 = vector.broadcast %63 : vector<1x8x1xf32> to vector<1x8x8xf32>
    %65 = arith.mulf %60, %64 : vector<1x8x8xf32>
    "tpu.trace_start"() <{level = 10 : i32, message = "bij,bjd->bid"}> : () -> ()
    %cst_24 = arith.constant dense<0.000000e+00> : vector<1x8x8xf32>
    %66 = tpu.matmul %65, %54, %cst_24 {dimension_numbers = #tpu.dot_dimension_numbers<[2], [1], [1], [2], [0, 0, 0, 1, 1, 2], [0], [0]>} : vector<1x8x8xf32>, vector<1x8x8xf32>, vector<1x8x8xf32> -> vector<1x8x8xf32>
    "tpu.trace_stop"() : () -> ()
    %67 = tpu.concatenate %24, %38, %52, %66 in 2 : vector<1x8x8xf32>, vector<1x8x8xf32>, vector<1x8x8xf32>, vector<1x8x8xf32> -> vector<1x8x32xf32>
    %68 = vector.shape_cast %67 : vector<1x8x32xf32> to vector<8x32xf32>
    %c0_25 = arith.constant 0 : index
    %c0_26 = arith.constant 0 : index
    %69 = vector.load %arg4[%c0_25, %c0_26] : memref<32x32xf32, #tpu.memory_space<vmem>>, vector<32x32xf32>
    %cst_27 = arith.constant dense<0.000000e+00> : vector<8x32xf32>
    %70 = tpu.matmul %68, %69, %cst_27 {dimension_numbers = #tpu.dot_dimension_numbers<[1], [0], [0], [1], [0, 0, 1, 1], [], []>} : vector<8x32xf32>, vector<32x32xf32>, vector<8x32xf32> -> vector<8x32xf32>
    %71 = vector.shape_cast %70 : vector<8x32xf32> to vector<1x8x32xf32>
    %c0_28 = arith.constant 0 : index
    %c0_29 = arith.constant 0 : index
    %72 = vector.load %arg5[%c0_28, %c0_29] : memref<1x32xf32, #tpu.memory_space<vmem>>, vector<1x32xf32>
    %73 = vector.shape_cast %72 : vector<1x32xf32> to vector<1x1x32xf32>
    %74 = vector.broadcast %73 : vector<1x1x32xf32> to vector<1x8x32xf32>
    %75 = arith.addf %71, %74 : vector<1x8x32xf32>
    %76 = tpu.concatenate %23, %37, %51, %65 in 2 : vector<1x8x8xf32>, vector<1x8x8xf32>, vector<1x8x8xf32>, vector<1x8x8xf32> -> vector<1x8x32xf32>
    %77 = tpu.concatenate %13, %27, %41, %55 in 2 : vector<1x8x8xf32>, vector<1x8x8xf32>, vector<1x8x8xf32>, vector<1x8x8xf32> -> vector<1x8x32xf32>
    %cst_30 = arith.constant 0.000000e+00 : f32
    %78 = vector.broadcast %cst_30 : f32 to vector<1x8x32xf32>
    %79 = tpu.concatenate %75, %76, %77, %78 in 2 : vector<1x8x32xf32>, vector<1x8x32xf32>, vector<1x8x32xf32>, vector<1x8x32xf32> -> vector<1x8x128xf32>
    %c0_31 = arith.constant 0 : index
    %c0_32 = arith.constant 0 : index
    %c0_33 = arith.constant 0 : index
    %80 = vector.load %arg6[%c0_31, %c0_32, %c0_33] : memref<1x8x128xf32, #tpu.memory_space<vmem>>, vector<1x8x128xf32>
    tpu.vector_store %arg6[%c0_31, %c0_32, %c0_33], %79 {strides = array<i32>} : memref<1x8x128xf32, #tpu.memory_space<vmem>>, vector<1x8x128xf32>,
    return
  }
  func.func @transform_0(%arg0: i32) -> (i32, i32, i32) {
    %c0_i32 = arith.constant 0 : i32
    %c0_i32_0 = arith.constant 0 : i32
    %c0_i32_1 = arith.constant 0 : i32
    return %arg0, %c0_i32, %c0_i32_0 : i32, i32, i32
  }
  func.func @transform_1(%arg0: i32) -> (i32, i32, i32) {
    %c0_i32 = arith.constant 0 : i32
    %c0_i32_0 = arith.constant 0 : i32
    %c0_i32_1 = arith.constant 0 : i32
    return %arg0, %c0_i32, %c0_i32_0 : i32, i32, i32
  }
  func.func @transform_2(%arg0: i32) -> (i32, i32) {
    %c0_i32 = arith.constant 0 : i32
    %c0_i32_0 = arith.constant 0 : i32
    %c0_i32_1 = arith.constant 0 : i32
    return %c0_i32, %c0_i32_0 : i32, i32
  }
  func.func @transform_3(%arg0: i32) -> (i32, i32) {
    %c0_i32 = arith.constant 0 : i32
    %c0_i32_0 = arith.constant 0 : i32
    %c0_i32_1 = arith.constant 0 : i32
    return %c0_i32, %c0_i32_0 : i32, i32
  }
  func.func @transform_4(%arg0: i32) -> (i32, i32) {
    %c0_i32 = arith.constant 0 : i32
    %c0_i32_0 = arith.constant 0 : i32
    %c0_i32_1 = arith.constant 0 : i32
    return %c0_i32, %c0_i32_0 : i32, i32
  }
  func.func @transform_5(%arg0: i32) -> (i32, i32, i32) {
    %c0_i32 = arith.constant 0 : i32
    %c0_i32_0 = arith.constant 0 : i32
    %c0_i32_1 = arith.constant 0 : i32
    return %arg0, %c0_i32, %c0_i32_0 : i32, i32, i32
  }
}

</mosaic_0001>

<bundles_post_ra>
// kernel: tpu_custom_call.1
= control target key start
LH: loop header
LB: loop body
LE: loop exit
PB: predicated region body
PF: predicated region fallthrough
CT: control target
= control target key end

     0   :  { %10 = vsyncpa [#allocation3], 0  ;;  %s846_s0 = inlined_call_operand.hbm [shape: f32[1,8,32], index: 0, kind: input, shape index: {}]   ;;  %s847_s1 = inlined_call_operand.hbm [shape: f32[1,8,32], index: 1, kind: input, shape index: {}]   ;;  %s848_s2 = inlined_call_operand.hbm [shape: f32[32,32], index: 2, kind: input, shape index: {}]   ;;  %s849_s3 = inlined_call_operand.hbm [shape: f32[32,32], index: 3, kind: input, shape index: {}]   ;;  %s850_s4 = inlined_call_operand.vmem [shape: f32[1,32], index: 4, kind: input, shape index: {}]   ;;  %s851_s5 = inlined_call_operand.hbm [shape: f32[1,8,128], index: 5, kind: output, shape index: {}]  }
   0x1   :  { %11 = vsyncpa [#allocation6], 0 }
   0x2   :  { %12 = vsyncpa [#allocation9], 0  ;;  %s30_s20 = sshll.u32 %s847_s1, 4  ;;  %s31_s20 = int_to_ptr.hbm [resolvable:$true] %s30_s20 }
   0x3   :  { %13 = vsyncpa [#allocation4], 0  ;;  %s719_s21 = smov [#allocation5]   ;;  %s19_s25 = sshll.u32 %s846_s0, 4  ;;  %s20_s25 = int_to_ptr.hbm [resolvable:$true] %s19_s25 }
   0x4   :  { %s32_s22 = sshll.u32 %s719_s21, 4  ;;  %s720_s26 = smov [#allocation2]   ;;  %s33_s22 = int_to_ptr.vmem [resolvable:$true] %s32_s22 }
   0x5   :  { %35 = dma.hbm_to_vmem [thread:$0]  %s31_s20, 128, %s33_s22, [#allocation6]  }
   0x6   :  { %s21_s27 = sshll.u32 %s720_s26, 4  ;;  %s40_s30 = sshll.u32 %s848_s2, 4  ;;  %s22_s27 = int_to_ptr.vmem [resolvable:$true] %s21_s27  ;;  %s41_s30 = int_to_ptr.hbm [resolvable:$true] %s40_s30 }
   0x7   :  { %24 = dma.hbm_to_vmem [thread:$0]  %s20_s25, 128, %s22_s27, [#allocation3]  }
   0x8   :  { %s721_s1 = smov [#allocation7]   ;;  %s53_s9 = sshll.u32 %s849_s3, 4  ;;  %s54_s9 = int_to_ptr.hbm [resolvable:$true] %s53_s9 }
   0x9   :  { %s42_s6 = sshll.u32 %s721_s1, 4  ;;  %s722_s10 = smov 128   ;;  %s43_s6 = int_to_ptr.vmem [resolvable:$true] %s42_s6 }
   0xa   :  { %s723_s0 = smov 8   ;;  %s724_s11 = smov [#allocation8]  }
   0xb   :  { %48 = dma.hbm_to_vmem [thread:$0]  %s41_s30, 512, %s43_s6, [#allocation6], %s722_s10, %s722_s10, %s723_s0  }
   0xc   :  { %s55_s12 = sshll.u32 %s724_s11, 4  ;;  %s56_s12 = int_to_ptr.vmem [resolvable:$true] %s55_s12 }
   0xd   :  { %61 = dma.hbm_to_vmem [thread:$0]  %s54_s9, 512, %s56_s12, [#allocation9], %s722_s10, %s722_s10, %s723_s0  }
   0xe   :  { %711 = dma.done.wait [#allocation3], 128  }
   0xf   :  { %712 = vsyncadd [#allocation3], 4294967168 }
  0x10   :  { %713 = dma.done.wait [#allocation6], 640  }
  0x11   :  { %714 = vsyncadd [#allocation6], 4294966656 }
  0x12   :  { %715 = dma.done.wait [#allocation9], 512  }
  0x13   :  { %716 = vsyncadd [#allocation9], 4294966784  ;;  %v85_v0 = vld [vmem:[#allocation7 + $0x18] sm:$0xff]  ;;  %v84_v1 = vld [vmem:[#allocation7 + $0x10] sm:$0xff]  ;;  %vm86_vm0 = vcmask 261120   ;;  %vm134_vm1 = vcmask 64512  }
  0x14   :  { %126 = vmatpush.msra.mxu1 %v85_v0  ;;  %102 = vmatpush.msra.mxu0 %v85_v0  ;;  %v83_v2 = vld [vmem:[#allocation7 + $0x8] sm:$0xff]  ;;  %v82_v3 = vld [vmem:[#allocation7] sm:$0xff]  ;;  %v81_v4 = vld [vmem:[#allocation5] sm:$0xff]  ;;  %s725_s2 = smov 104   ;;  %s726_s3 = smov 120  }
  0x15   :  { %v80_v5 = vld [vmem:[#allocation2] sm:$0xff]  ;;  %s727_s13 = smov 112   ;;  %s728_s14 = smov 16  }
  0x16   :  { %127 = vmatpush.msra.mxu1 %v84_v1  ;;  %103 = vmatpush.msra.mxu0 %v84_v1  ;;  %s729_s15 = smov 24   ;;  %s730_s16 = smov 32  }
  0x17   :  { %s731_s17 = smov 64   ;;  %s732_s20 = smov [#allocation10]  }
  0x18   :  { %128 = vmatpush.msra.mxu1 %v83_v2  ;;  %104 = vmatpush.msra.mxu0 %v83_v2  ;;  %s531_s21 = sshll.u32 %s732_s20, 4  ;;  %s533_s24 = sshll.u32 %s851_s5, 4  ;;  %s532_s21 = int_to_ptr.vmem [resolvable:$true] %s531_s21  ;;  %s534_s24 = int_to_ptr.hbm [resolvable:$true] %s533_s24 }
  0x1a   :  { %129 = vmatpush.msra.mxu1 %v82_v3  ;;  %105 = vmatpush.msra.mxu0 %v82_v3 }
  0x1b   :  { %546 = vmatmul.msk.f32.vlgmr.msra.gmra.mxu1 %vm86_vm0, %v81_v4  ;;  %545 = vmatmul.msk.f32.vlgmr.msra.gmra.mxu0 %vm86_vm0, %v80_v5 }
  0x98   :  { %v131_v6 = vpop.f32.mrf.mxu1  ;;  %v107_v7 = vpop.f32.mrf.mxu0 }
  0x99   :  { %362 = vrot.lane.b32.xlu2 %v131_v6, %s725_s2  ;;  %210 = vrot.lane.b32.xlu1 %v131_v6, %s726_s3  ;;  %v110_v8 = vmul.f32 0.35355338, %v107_v7 }
  0x9a   :  { %547 = vmatpush.xpose.msk.msra.mxu2 %vm134_vm1, %v131_v6  ;;  %203 = vmatpush.msra.mxu3 %v131_v6 }
  0x9d   :  { %548 = vmatmul.msk.f32.vlgmr.msra.gmra.mxu2 %vm134_vm1, %v110_v8 }
  0xa1   :  { %360 = vrot.lane.b32.xlu2 %v110_v8, %s725_s2  ;;  %208 = vrot.lane.b32.xlu1 %v110_v8, %s726_s3 }
  0xa9   :  { %284 = vrot.lane.b32.xlu1 %v110_v8, %s727_s13 }
  0xf3   :  { %v363_v10 = vpop.permute.xlu2 %362 }
  0xfb   :  { %v361_v33 = vpop.permute.xlu2 %360 }
 0x10b   :  { %v211_v9 = vpop.permute.xlu1 %210 }
 0x10c   :  { %550 = vmatpush.xpose.msk.msrb.mxu3 %vm134_vm1, %v211_v9  ;;  %279 = vmatpush.msrb.mxu2 %v211_v9 }
 0x10e   :  { %431 = vmatpush.msra.mxu2 %v363_v10 }
 0x113   :  { %v209_v23 = vpop.permute.xlu1 %208 }
 0x11b   :  { %v285_v32 = vpop.permute.xlu1 %284 }
 0x120   :  { %v782_v11 = vpop.f32.mrf.mxu2 }
 0x121   :  { %v161_v12 = vsel %vm134_vm1, %v782_v11, -inf }
 0x122   :  { %162 = vmax.xlane.f32.xlu0 %v161_v12 }
 0x195   :  { %v163_v13 = vpop.xlane.xlu0 %162 }
 0x196   :  { %v164_v14 = vsub.f32 %v782_v11, %v163_v13 }
 0x198   :  { %v165_v15 = vmul.f32 1.442695, %v164_v14 }
 0x19a   :  { %575 = vpow2.f32 %v165_v15 }
 0x1a0   :  { %v576_v16 = vpop.eup %575 }
 0x1a1   :  { %v167_v17 = vsel %vm134_vm1, %v576_v16, 0.0 }
 0x1a2   :  { %168 = vadd.xlane.f32.xlu0 %v167_v17 }
 0x1b6   :  { %286 = vrot.lane.b32.xlu0 %v131_v6, %s727_s13 }
 0x215   :  { %v169_v18 = vpop.xlane.xlu0 %168 }
 0x216   :  { %577 = vrcp.f32 %v169_v18  ;;  %v181_v22 = vand.u32 2147483648, %v169_v18  ;;  %v179_v25 = vand.u32 2147483647, %v169_v18  ;;  %vm175_vm3 = vweird.f32 %v169_v18 }
 0x218   :  { %v182_v27 = vor.u32 1.1754944e-38, %v181_v22  ;;  %vm180_vm5 = vcmp.eq.f32.partialorder %v179_v25, 8.507059e+37 }
 0x21c   :  { %v578_v19 = vpop.eup %577 }
 0x21d   :  { %v171_v20 = vmul.f32 %v578_v19, %v169_v18  ;;  %vm176_vm2 = vweird.f32 %v578_v19 }
 0x21e   :  { %vm177_vm4 = vmor %vm175_vm3, %vm176_vm2 }
 0x21f   :  { %v172_v21 = vsub.f32 1.0, %v171_v20 }
 0x221   :  { %v173_v24 = vmul.f32 %v578_v19, %v172_v21 }
 0x223   :  { %v174_v26 = vadd.f32 %v578_v19, %v173_v24 }
 0x225   :  { %v178_v28 = vsel %vm177_vm4, %v578_v19, %v174_v26  ;;  %vm449_vm4 = vcmask 130048  }
 0x226   :  { %v183_v29 = vsel %vm180_vm5, %v182_v27, %v178_v28  ;;  %vm451_vm5 = vcmask 195584  }
 0x227   :  { %v788_v30 = vmul.f32 %v576_v16, %v183_v29 }
 0x228   :  { %v287_v31 = vpop.permute.xlu0 %286 }
 0x229   :  { %549 = vmatmul.msk.f32.vlgmr.msra.gmra.mxu3 %vm134_vm1, %v788_v30  ;;  %553 = vmatpush.xpose.msk.msrb.mxu0 %vm134_vm1, %v287_v31 }
 0x22a   :  { %355 = vmatpush.msrb.mxu1 %v287_v31  ;;  %556 = vmatpush.xpose.msk.msra.mxu3 %vm134_vm1, %v363_v10 }
 0x22c   :  { %554 = vmatmul.msk.f32.vlgmr.msrb.gmra.mxu0 %vm134_vm1, %v285_v32 }
 0x231   :  { %551 = vmatmul.msk.f32.vlgmr.msrb.gmra.mxu3 %vm134_vm1, %v209_v23 }
 0x239   :  { %557 = vmatmul.msk.f32.vlgmr.msra.gmra.mxu3 %vm134_vm1, %v361_v33  ;;  %v456_v33 = vld [vmem:[#allocation8 + $0x18] sm:$0xff] }
 0x23a   :  { %472 = vmatpush.msra.mxu0 %v456_v33 }
 0x2a9   :  { %v797_v34 = vpop.f32.mrf.mxu0 }
 0x2aa   :  { %v312_v35 = vsel %vm134_vm1, %v797_v34, -inf }
 0x2ab   :  { %313 = vmax.xlane.f32.xlu0 %v312_v35  ;;  %v455_v35 = vld [vmem:[#allocation8 + $0x10] sm:$0xff] }
 0x2ac   :  { %v801_v36 = vpop.f32.mrf.mxu3  ;;  %473 = vmatpush.msra.mxu0 %v455_v35 }
 0x2b4   :  { %v803_v37 = vpop.f32.mrf.mxu3 }
 0x2b5   :  { %v236_v38 = vsel %vm134_vm1, %v803_v37, -inf }
 0x2b6   :  { %237 = vmax.xlane.f32.xlu2 %v236_v38  ;;  %v454_v38 = vld [vmem:[#allocation8 + $0x8] sm:$0xff] }
 0x2b7   :  { %474 = vmatpush.msra.mxu0 %v454_v38 }
 0x2bc   :  { %v807_v39 = vpop.f32.mrf.mxu3 }
 0x2bd   :  { %v388_v40 = vsel %vm134_vm1, %v807_v39, -inf }
 0x2be   :  { %389 = vmax.xlane.f32.xlu1 %v388_v40 }
 0x31e   :  { %v314_v41 = vpop.xlane.xlu0 %313 }
 0x31f   :  { %v315_v42 = vsub.f32 %v797_v34, %v314_v41 }
 0x321   :  { %v316_v43 = vmul.f32 1.442695, %v315_v42 }
 0x323   :  { %579 = vpow2.f32 %v316_v43 }
 0x329   :  { %v580_v44 = vpop.eup %579  ;;  %v238_v45 = vpop.xlane.xlu2 %237 }
 0x32a   :  { %v239_v46 = vsub.f32 %v803_v37, %v238_v45  ;;  %v318_v47 = vsel %vm134_vm1, %v580_v44, 0.0 }
 0x32b   :  { %319 = vadd.xlane.f32.xlu1 %v318_v47 }
 0x32c   :  { %v240_v48 = vmul.f32 1.442695, %v239_v46 }
 0x32e   :  { %581 = vpow2.f32 %v240_v48 }
 0x331   :  { %v390_v49 = vpop.xlane.xlu1 %389 }
 0x332   :  { %v391_v50 = vsub.f32 %v807_v39, %v390_v49 }
 0x334   :  { %v582_v51 = vpop.eup %581  ;;  %v392_v52 = vmul.f32 1.442695, %v391_v50 }
 0x335   :  { %v242_v53 = vsel %vm134_vm1, %v582_v51, 0.0 }
 0x336   :  { %583 = vpow2.f32 %v392_v52  ;;  %243 = vadd.xlane.f32.xlu2 %v242_v53 }
 0x33c   :  { %v584_v54 = vpop.eup %583 }
 0x33d   :  { %v394_v55 = vsel %vm134_vm1, %v584_v54, 0.0 }
 0x33e   :  { %395 = vadd.xlane.f32.xlu2 %v394_v55 }
 0x39e   :  { %v320_v56 = vpop.xlane.xlu1 %319 }
 0x39f   :  { %585 = vrcp.f32 %v320_v56  ;;  %v332_v60 = vand.u32 2147483648, %v320_v56  ;;  %v330_v63 = vand.u32 2147483647, %v320_v56  ;;  %vm326_vm7 = vweird.f32 %v320_v56 }
 0x3a1   :  { %v333_v1 = vor.u32 1.1754944e-38, %v332_v60  ;;  %vm331_vm9 = vcmp.eq.f32.partialorder %v330_v63, 8.507059e+37 }
 0x3a5   :  { %v586_v57 = vpop.eup %585 }
 0x3a6   :  { %v322_v58 = vmul.f32 %v586_v57, %v320_v56  ;;  %vm327_vm6 = vweird.f32 %v586_v57 }
 0x3a7   :  { %vm328_vm8 = vmor %vm326_vm7, %vm327_vm6  ;;  %vm521_vm6 = vcmask 523264  }
 0x3a8   :  { %v323_v59 = vsub.f32 1.0, %v322_v58 }
 0x3a9   :  { %v244_v61 = vpop.xlane.xlu2 %243 }
 0x3aa   :  { %v324_v62 = vmul.f32 %v586_v57, %v323_v59  ;;  %587 = vrcp.f32 %v244_v61  ;;  %v256_v9 = vand.u32 2147483648, %v244_v61  ;;  %v254_v12 = vand.u32 2147483647, %v244_v61 }
 0x3ab   :  { %vm250_vm11 = vweird.f32 %v244_v61 }
 0x3ac   :  { %v325_v0 = vadd.f32 %v586_v57, %v324_v62  ;;  %v257_v15 = vor.u32 1.1754944e-38, %v256_v9  ;;  %vm255_vm13 = vcmp.eq.f32.partialorder %v254_v12, 8.507059e+37 }
 0x3ae   :  { %v329_v2 = vsel %vm328_vm8, %v586_v57, %v325_v0 }
 0x3af   :  { %v334_v3 = vsel %vm331_vm9, %v333_v1, %v329_v2 }
 0x3b0   :  { %v588_v4 = vpop.eup %587  ;;  %v335_v5 = vmul.f32 %v580_v44, %v334_v3 }
 0x3b1   :  { %v246_v6 = vmul.f32 %v588_v4, %v244_v61  ;;  %v396_v7 = vpop.xlane.xlu2 %395  ;;  %vm251_vm10 = vweird.f32 %v588_v4 }
 0x3b2   :  { %589 = vrcp.f32 %v396_v7  ;;  %555 = vmatmul.msk.f32.vlgmr.msrb.gmra.mxu1 %vm134_vm1, %v335_v5  ;;  %vm252_vm12 = vmor %vm250_vm11, %vm251_vm10  ;;  %v408_v21 = vand.u32 2147483648, %v396_v7  ;;  %v406_v23 = vand.u32 2147483647, %v396_v7  ;;  %vm402_vm15 = vweird.f32 %v396_v7 }
 0x3b3   :  { %v247_v8 = vsub.f32 1.0, %v246_v6 }
 0x3b4   :  { %v409_v25 = vor.u32 1.1754944e-38, %v408_v21  ;;  %vm407_vm3 = vcmp.eq.f32.partialorder %v406_v23, 8.507059e+37 }
 0x3b5   :  { %v248_v10 = vmul.f32 %v588_v4, %v247_v8 }
 0x3b7   :  { %v249_v13 = vadd.f32 %v588_v4, %v248_v10 }
 0x3b8   :  { %v590_v14 = vpop.eup %589 }
 0x3b9   :  { %v398_v16 = vmul.f32 %v590_v14, %v396_v7  ;;  %v253_v17 = vsel %vm252_vm12, %v588_v4, %v249_v13  ;;  %vm403_vm14 = vweird.f32 %v590_v14 }
 0x3ba   :  { %v258_v18 = vsel %vm255_vm13, %v257_v15, %v253_v17  ;;  %vm404_vm2 = vmor %vm402_vm15, %vm403_vm14 }
 0x3bb   :  { %v399_v19 = vsub.f32 1.0, %v398_v16  ;;  %v259_v20 = vmul.f32 %v582_v51, %v258_v18 }
 0x3bd   :  { %v400_v22 = vmul.f32 %v590_v14, %v399_v19  ;;  %552 = vmatmul.msk.f32.vlgmr.msrb.gmra.mxu2 %vm134_vm1, %v259_v20 }
 0x3bf   :  { %v401_v24 = vadd.f32 %v590_v14, %v400_v22 }
 0x3c1   :  { %v405_v26 = vsel %vm404_vm2, %v590_v14, %v401_v24 }
 0x3c2   :  { %v410_v27 = vsel %vm407_vm3, %v409_v25, %v405_v26 }
 0x3c3   :  { %v411_v28 = vmul.f32 %v584_v54, %v410_v27 }
 0x3c5   :  { %558 = vmatmul.msk.f32.vlgmr.msra.gmra.mxu2 %vm134_vm1, %v411_v28 }
 0x42f   :  { %v357_v29 = vpop.f32.mrf.mxu1 }
 0x430   :  { %441 = vrot.lane.b32.xlu1 %v357_v29, %s728_s14 }
 0x438   :  { %498 = vrot.lane.b32.xlu1 %v803_v37, %s723_s0  ;;  %v453_v37 = vld [vmem:[#allocation8] sm:$0xff] }
 0x439   :  { %475 = vmatpush.msra.mxu0 %v453_v37 }
 0x440   :  { %v281_v31 = vpop.f32.mrf.mxu2  ;;  %506 = vrot.lane.b32.xlu1 %v807_v39, %s729_s15 }
 0x441   :  { %437 = vrot.lane.b32.xlu2 %v281_v31, %s723_s0 }
 0x448   :  { %v433_v32 = vpop.f32.mrf.mxu2 }
 0x449   :  { %485 = vrot.lane.b32.xlu2 %v259_v20, %s723_s0  ;;  %445 = vrot.lane.b32.xlu0 %v433_v32, %s729_s15 }
 0x451   :  { %491 = vrot.lane.b32.xlu2 %v411_v28, %s729_s15  ;;  %488 = vrot.lane.b32.xlu0 %v335_v5, %s728_s14 }
 0x459   :  { %502 = vrot.lane.b32.xlu0 %v797_v34, %s728_s14 }
 0x49b   :  { %v438_v40 = vpop.permute.xlu2 %437 }
 0x49c   :  { %v448_v41 = vsel %vm134_vm1, %v801_v36, %v438_v40 }
 0x4a2   :  { %v442_v39 = vpop.permute.xlu1 %441 }
 0x4a3   :  { %v486_v42 = vpop.permute.xlu2 %485  ;;  %v450_v43 = vsel %vm449_vm4, %v448_v41, %v442_v39 }
 0x4a4   :  { %v494_v46 = vsel %vm134_vm1, %v788_v30, %v486_v42  ;;  %v574_v30 = vld [vmem:[%s850_s4] ss:$0 sm:$0xff] }
 0x4aa   :  { %v499_v45 = vpop.permute.xlu1 %498 }
 0x4ab   :  { %v492_v48 = vpop.permute.xlu2 %491  ;;  %v509_v36 = vsel %vm134_vm1, %v782_v11, %v499_v45  ;;  %vm523_vm1 = vcmask 785408  }
 0x4b2   :  { %v507_v52 = vpop.permute.xlu1 %506 }
 0x4bb   :  { %v446_v44 = vpop.permute.xlu0 %445 }
 0x4bc   :  { %v452_v34 = vsel %vm451_vm5, %v450_v43, %v446_v44 }
 0x4bd   :  { %559 = vmatmul.msk.f32.vlgmr.msra.gmra.mxu0 %vm86_vm0, %v452_v34 }
 0x4c3   :  { %v489_v47 = vpop.permute.xlu0 %488 }
 0x4c4   :  { %v495_v49 = vsel %vm449_vm4, %v494_v46, %v489_v47 }
 0x4c5   :  { %v496_v50 = vsel %vm451_vm5, %v495_v49, %v492_v48 }
 0x4c6   :  { %513 = vrot.lane.b32.xlu2 %v496_v50, %s730_s16 }
 0x4cb   :  { %v503_v51 = vpop.permute.xlu0 %502 }
 0x4cc   :  { %v510_v53 = vsel %vm449_vm4, %v509_v36, %v503_v51 }
 0x4cd   :  { %v511_v54 = vsel %vm451_vm5, %v510_v53, %v507_v52 }
 0x4ce   :  { %517 = vrot.lane.b32.xlu0 %v511_v54, %s731_s17 }
 0x520   :  { %v514_v11 = vpop.permute.xlu2 %513 }
 0x53a   :  { %v477_v55 = vpop.f32.mrf.mxu0 }
 0x53b   :  { %v484_v56 = vadd.f32 %v574_v30, %v477_v55 }
 0x53d   :  { %v520_v57 = vsel %vm86_vm0, %v484_v56, %v514_v11 }
 0x540   :  { %v518_v58 = vpop.permute.xlu0 %517 }
 0x541   :  { %v522_v59 = vsel %vm521_vm6, %v520_v57, %v518_v58 }
 0x542   :  { %v524_v60 = vsel %vm523_vm1, %v522_v59, 0.0 }
 0x543   :  { %525 = vst [vmem:[#allocation10] sm:$0xff] %v524_v60 }
 0x544   :  { %536 = dma.vmem_to_hbm [thread:$0]  %s532_s21, 128, %s534_s24, [#allocation4]  }
 0x545   :  { %717 = dma.done.wait [#allocation4], 128  }
 0x546   :  { %718 = vsyncadd [#allocation4], 4294967168 }
 0x547   :  { %541 = vsyncpa [#allocation3], 1 }
 0x548   :  { %542 = vsyncpa [#allocation6], 1 }
 0x549   :  { %543 = vsyncpa [#allocation9], 1 }
 0x54a   :  { %544 = vsyncpa [#allocation4], 1 }

</bundles_post_ra>
